<compile_context>
chip_gen: v5e
topology: v5e:2x2
jax: 0.10.0
libtpu: 0.0.40
codegen_flags: <defaults>
</compile_context>

<pallas_src>
import math

import jax
import jax.numpy as jnp
import numpy as np
from jax import lax
from jax.experimental import pallas as pl
from jax.experimental.pallas import tpu as pltpu

LANE = 128


def _round_up(n, m):
    return (n + m - 1) // m * m


def _pick_batch_tile(batch, seq_len, num_cores=1, target_rows=512):
    """TB sequences per grid step.

    The grid is a sequential loop (~0.35us/step) and rows = TB*seq_len is the
    MXU M dim, so target >= 512 rows per step (two passes of a 256-tall MXU on
    v6e/v7x, four of a 128-tall one on v5e).  Only force a split across
    TensorCores (v7x: num_cores=2) when each resulting block still gets >= 256
    rows; on the single-TC v5e/v6e extra blocks are pure serial overhead.
    """
    tb = min(batch, max(1, pl.cdiv(target_rows, seq_len)))
    if num_cores > 1 and pl.cdiv(batch, tb) < num_cores:
        tb_split = pl.cdiv(batch, num_cores)
        if tb_split * seq_len >= 256:
            tb = tb_split
    # (8, 128) rule: block rows must be a multiple of 8 unless the single
    # block spans the whole array.
    while tb < batch and (tb * seq_len) % 8 != 0:
        tb += 1
    if tb >= batch:
        tb = batch
    return tb


def make_encoder_kernel(num_layers, kernel_size, dilation_base, seq_len, rows,
                        c_out_real, pe_is_tiled, matmul_dtype,
                        roll_in_matmul_dtype):
    """rows = TB * seq_len (flattened batch-tile x sequence rows)."""

    def kernel(x_ref, pe_ref, wp_ref, *refs):
        conv_refs = refs[:2 * num_layers]
        ln_w_ref, ln_b_ref, out_ref = refs[2 * num_layers:]

        # Hoisted iota (JAX does not CSE broadcast_in_dim); only needed when
        # there are shifted taps.
        seq_pos = None
        if kernel_size > 1:
            seq_pos = lax.broadcasted_iota(jnp.int32, (rows, 1), 0) % seq_len

        # Input projection: bf16 MXU operands, f32 accumulation.  b_proj is
        # pre-folded into the PE table in the wrapper.
        h = jnp.dot(x_ref[...].astype(matmul_dtype), wp_ref[...],
                    preferred_element_type=jnp.float32)

        # + positional encoding.
        if pe_is_tiled:
            h = h + pe_ref[...]                                   # (rows, C)
        else:
            c = h.shape[-1]                                       # (S, C) resident
            h = (h.reshape(rows // seq_len, seq_len, c)
                 + pe_ref[...][None]).reshape(rows, c)

        # Causal dilated Conv1d stack.  Each tap = sublane roll + per-sequence
        # mask; all K taps are concatenated along lanes and contracted in ONE
        # (rows, K*C_in) @ (K*C_in, C_out) matmul per layer.
        for i in range(num_layers):
            w_ref = conv_refs[2 * i]      # (K*C_in_pad, C_out_pad), matmul dtype
            b_ref = conv_refs[2 * i + 1]  # (1, C_out_pad), f32
            dilation = dilation_base ** i
            h16 = h.astype(matmul_dtype)  # cast once per layer (hoisted)
            src = h16 if roll_in_matmul_dtype else h
            taps = []
            for j in range(kernel_size):
                shift = (kernel_size - 1 - j) * dilation
                if shift == 0:
                    taps.append(h16)
                elif shift >= seq_len:
                    taps.append(jnp.zeros_like(h16))
                else:
                    # tap[r] = h[r - shift] within each sequence; the first
                    # `shift` rows of every sequence are zero (causal pad),
                    # which also kills wrap / cross-sequence leakage from
                    # rolling the flattened (TB*S) axis.
                    rolled = pltpu.roll(src, shift, axis=0)
                    masked = jnp.where(seq_pos >= shift, rolled,
                                       jnp.zeros_like(rolled))
                    taps.append(masked.astype(matmul_dtype))
            x_cat = taps[0] if len(taps) == 1 else jnp.concatenate(taps, axis=-1)
            acc = jnp.dot(x_cat, w_ref[...], preferred_element_type=jnp.float32)
            h = jnp.maximum(acc + b_ref[...], 0.0)    # bias + ReLU, f32 on VPU

        # LayerNorm over the *real* channels via E[x^2] - E[x]^2.  Padded
        # lanes of h are exactly zero, so both sums already cover only the
        # real channels; padded output lanes are zeroed by zero-padded ln_w/b.
        inv_c = 1.0 / float(c_out_real)
        mean = jnp.sum(h, axis=-1, keepdims=True) * inv_c
        mean_sq = jnp.sum(h * h, axis=-1, keepdims=True) * inv_c
        var = jnp.maximum(mean_sq - mean * mean, 0.0)
        hn = (h - mean) * lax.rsqrt(var + 1e-5)
        out_ref[...] = (hn * ln_w_ref[...] + ln_b_ref[...]).astype(out_ref.dtype)

    return kernel


def per_sensor_encoder_cnn(x, params, *, num_layers, kernel_size, dilation_base,
                           matmul_dtype=jnp.bfloat16, num_cores=1,
                           out_dtype=None):
    """Fused encoder forward as one Pallas kernel over batch tiles.

    Pass num_cores=2 on v7x (2 TensorCores/chip); keep the default 1 on
    v5e/v6e.  Pass out_dtype=jnp.bfloat16 if downstream consumers accept bf16
    (halves HBM writeback); default keeps x.dtype.
    """
    B, S, input_dim = x.shape
    proj_dim = params["w_proj"].shape[1]
    cnn_out_dim = params["conv_w"][-1].shape[2]
    out_dtype = x.dtype if out_dtype is None else out_dtype

    c_proj = _round_up(proj_dim, LANE)
    c_out = _round_up(cnn_out_dim, LANE)

    TB = _pick_batch_tile(B, S, num_cores=num_cores)
    rows = TB * S
    num_blocks = pl.cdiv(B, TB)
    B_pad = num_blocks * TB

    def pad_cols(a, cols):
        return a if a.shape[-1] == cols else jnp.pad(a, ((0, 0), (0, cols - a.shape[-1])))

    # Lane-pad every channel dim to a multiple of 128 (padded entries are
    # zero, so the math is unchanged); pre-cast MXU operands; fold b_proj into
    # the PE table (one-time host-side add).
    wp = pad_cols(params["w_proj"], c_proj).astype(matmul_dtype)
    pe_base = pad_cols(params["pe"] + params["b_proj"], c_proj)      # (S, c_proj) f32

    conv_ops = []
    for w, b in zip(params["conv_w"], params["conv_b"]):
        k, ci, co = w.shape
        ci_p, co_p = _round_up(ci, LANE), _round_up(co, LANE)
        w_flat = jnp.pad(w, ((0, 0), (0, ci_p - ci), (0, co_p - co))
                         ).reshape(k * ci_p, co_p).astype(matmul_dtype)
        conv_ops += [w_flat, pad_cols(b, co_p)]
    ln_w = pad_cols(params["ln_w"], c_out)
    ln_b = pad_cols(params["ln_b"], c_out)

    # Flatten to a lane-dense 2-D slab; pad the batch so TB | B (no OOB reads
    # on a partial last block).  Padded rows are computed and sliced off.
    x2 = x.reshape(B * S, input_dim)
    if B_pad != B:
        x2 = jnp.pad(x2, ((0, (B_pad - B) * S), (0, 0)))

    def run(conservative):
        # conservative=True reproduces the previously-validated lowering
        # paths: pre-tiled PE, f32 rolls, default double-buffered constants.
        pe_is_tiled = conservative or (S % 8 != 0)
        pe = jnp.tile(pe_base, (TB, 1)) if pe_is_tiled else pe_base
        operands = [x2, pe, wp] + conv_ops + [ln_w, ln_b]

        def const_spec(a):
            if conservative:
                return pl.BlockSpec(a.shape, lambda b: (0, 0))
            # Loop-invariant constants are never re-fetched: one VMEM buffer
            # is enough (halves their resident footprint).
            return pl.BlockSpec(a.shape, lambda b: (0, 0),
                                pipeline_mode=pl.Buffered(1))

        in_specs = ([pl.BlockSpec((rows, input_dim), lambda b: (b, 0))]
                    + [const_spec(a) for a in operands[1:]])

        # Explicit VMEM budget: resident constants + double-buffered in/out
        # tiles + generous slack for intermediates (>= 8 MiB floor).
        const_bytes = sum(int(np.prod(a.shape)) * a.dtype.itemsize
                          for a in operands[1:])
        tile_bytes = rows * (input_dim + c_out) * 4
        scratch_bytes = 8 * rows * max(kernel_size * c_proj, c_out) * 4
        vmem_limit = int(min(64 << 20, max(8 << 20, 2 * const_bytes
                                           + 2 * tile_bytes + scratch_bytes)))

        kernel = make_encoder_kernel(
            num_layers, kernel_size, dilation_base, S, rows, cnn_out_dim,
            pe_is_tiled, matmul_dtype, roll_in_matmul_dtype=not conservative)

        out = pl.pallas_call(
            kernel,
            out_shape=jax.ShapeDtypeStruct((B_pad * S, c_out), out_dtype),
            grid=(num_blocks,),
            in_specs=in_specs,
            out_specs=pl.BlockSpec((rows, c_out), lambda b: (b, 0)),
            compiler_params=pltpu.CompilerParams(
                dimension_semantics=("parallel",),
                vmem_limit_bytes=vmem_limit),
        )(*operands)
        return jax.block_until_ready(out)

    try:
        out = run(conservative=False)
    except Exception:
        # Fall back to the battle-tested lowerings if the aggressive path
        # (Buffered(1) constants / bf16 sublane roll / in-kernel PE reshape)
        # is rejected by this Mosaic version.
        out = run(conservative=True)

    # Drop batch padding and padded output lanes outside the kernel.
    return out.reshape(B_pad, S, c_out)[:B, :, :cnn_out_dim]


def reference_forward(x, params, *, num_layers, kernel_size, dilation_base,
                      matmul_dtype=jnp.bfloat16):
    """Pure-JAX reference mirroring the PyTorch forward semantics (same matmul
    dtype as the kernel: bf16 operands, f32 accumulation)."""
    B, S, _ = x.shape
    dd = matmul_dtype
    h = jnp.einsum("bsi,io->bso", x.astype(dd), params["w_proj"].astype(dd),
                   preferred_element_type=jnp.float32)
    h = h + params["b_proj"]
    h = h + params["pe"][None]
    for i in range(num_layers):
        w = params["conv_w"][i].astype(dd)
        b = params["conv_b"][i]
        d = dilation_base ** i
        hd = h.astype(dd)
        acc = None
        for j in range(kernel_size):
            shift = (kernel_size - 1 - j) * d
            xs = hd if shift == 0 else jnp.pad(hd, ((0, 0), (shift, 0), (0, 0)))[:, :S, :]
            tap = jnp.einsum("bsc,co->bso", xs, w[j], preferred_element_type=jnp.float32)
            acc = tap if acc is None else acc + tap
        h = jax.nn.relu(acc + b)
    mean = h.mean(-1, keepdims=True)
    var = ((h - mean) ** 2).mean(-1, keepdims=True)
    hn = (h - mean) * lax.rsqrt(var + 1e-5)
    return hn * params["ln_w"] + params["ln_b"]


def positional_encoding(seq_len, d_model):
    position = jnp.arange(seq_len, dtype=jnp.float32)[:, None]
    div_term = jnp.exp(jnp.arange(0, d_model, 2, dtype=jnp.float32)
                       * (-math.log(10000.0) / d_model))
    pe = jnp.zeros((seq_len, d_model), jnp.float32)
    pe = pe.at[:, 0::2].set(jnp.sin(position * div_term))
    pe = pe.at[:, 1::2].set(jnp.cos(position * div_term))
    return pe


if __name__ == "__main__":
    # Small shapes implied by the module's forward.
    B, seq_len = 2, 16
    input_dim, proj_dim, cnn_out_dim = 8, 32, 32
    num_layers, kernel_size, dilation_base = 2, 3, 2

    key = jax.random.PRNGKey(0)
    keys = jax.random.split(key, 4 + 2 * num_layers)

    params = {
        "pe": positional_encoding(seq_len, proj_dim),
        "w_proj": 0.1 * jax.random.normal(keys[0], (input_dim, proj_dim), jnp.float32),
        "b_proj": 0.1 * jax.random.normal(keys[1], (1, proj_dim), jnp.float32),
        "conv_w": [],
        "conv_b": [],
        "ln_w": 1.0 + 0.1 * jax.random.normal(keys[2], (1, cnn_out_dim), jnp.float32),
        "ln_b": 0.1 * jax.random.normal(keys[3], (1, cnn_out_dim), jnp.float32),
    }
    c_in = proj_dim
    for i in range(num_layers):
        c_out = cnn_out_dim if i == num_layers - 1 else proj_dim
        # stored as (K, C_in, C_out)  (PyTorch Conv1d weight transposed)
        params["conv_w"].append(
            0.1 * jax.random.normal(keys[4 + 2 * i], (kernel_size, c_in, c_out), jnp.float32))
        params["conv_b"].append(
            0.1 * jax.random.normal(keys[5 + 2 * i], (1, c_out), jnp.float32))
        c_in = c_out

    x = jax.random.normal(jax.random.PRNGKey(42), (B, seq_len, input_dim), jnp.float32)

    out = per_sensor_encoder_cnn(
        x, params, num_layers=num_layers, kernel_size=kernel_size,
        dilation_base=dilation_base, matmul_dtype=jnp.bfloat16)
    out = jax.block_until_ready(out)

    ref = reference_forward(
        x, params, num_layers=num_layers, kernel_size=kernel_size,
        dilation_base=dilation_base, matmul_dtype=jnp.bfloat16)
    # bf16 MXU operands in both paths (f32 accumulation); differences are only
    # accumulation-order / variance-formulation level, well inside tolerance.
    np.testing.assert_allclose(np.asarray(out), np.asarray(ref), rtol=2e-3, atol=2e-3)

    print("KERNEL_OK")
</pallas_src>

<mosaic_0001>
module attributes {stable_mosaic.version = 11 : i64} {
  func.func @kernel(%arg0: i32, %arg1: memref<32x8xf32, #tpu.memory_space<vmem>>, %arg2: memref<16x128xf32, #tpu.memory_space<vmem>>, %arg3: memref<8x128xbf16, #tpu.memory_space<vmem>>, %arg4: memref<384x128xbf16, #tpu.memory_space<vmem>>, %arg5: memref<1x128xf32, #tpu.memory_space<vmem>>, %arg6: memref<384x128xbf16, #tpu.memory_space<vmem>>, %arg7: memref<1x128xf32, #tpu.memory_space<vmem>>, %arg8: memref<1x128xf32, #tpu.memory_space<vmem>>, %arg9: memref<1x128xf32, #tpu.memory_space<vmem>>, %arg10: memref<32x128xf32, #tpu.memory_space<vmem>>) attributes {dimension_semantics = [#tpu.dimension_semantics<parallel>], iteration_bounds = array<i64: 1>, scalar_prefetch = 0 : i64, scratch_operands = 0 : i64, tpu.core_type = #tpu.core_type<tc>, window_params = [{transform_indices = @transform_0, window_bounds = array<i64: 32, 8>}, {pipeline_mode = #tpu.pipeline_mode<synchronous>, transform_indices = @transform_1, window_bounds = array<i64: 16, 128>}, {pipeline_mode = #tpu.pipeline_mode<synchronous>, transform_indices = @transform_2, window_bounds = array<i64: 8, 128>}, {pipeline_mode = #tpu.pipeline_mode<synchronous>, transform_indices = @transform_3, window_bounds = array<i64: 384, 128>}, {pipeline_mode = #tpu.pipeline_mode<synchronous>, transform_indices = @transform_4, window_bounds = array<i64: 1, 128>}, {pipeline_mode = #tpu.pipeline_mode<synchronous>, transform_indices = @transform_5, window_bounds = array<i64: 384, 128>}, {pipeline_mode = #tpu.pipeline_mode<synchronous>, transform_indices = @transform_6, window_bounds = array<i64: 1, 128>}, {pipeline_mode = #tpu.pipeline_mode<synchronous>, transform_indices = @transform_7, window_bounds = array<i64: 1, 128>}, {pipeline_mode = #tpu.pipeline_mode<synchronous>, transform_indices = @transform_8, window_bounds = array<i64: 1, 128>}, {transform_indices = @transform_9, window_bounds = array<i64: 32, 128>}]} {
    %0 = tpu.iota {dimensions = array<i32: 0>} : vector<32x1xi32>
    %c16_i32 = arith.constant 16 : i32
    %c0_i32 = arith.constant 0 : i32
    %1 = arith.cmpi eq, %c16_i32, %c0_i32 : i32
    %c1_i32 = arith.constant 1 : i32
    %2 = arith.select %1, %c1_i32, %c16_i32 : i32
    %3 = vector.broadcast %2 : i32 to vector<32x1xi32>
    %4 = arith.remsi %0, %3 : vector<32x1xi32>
    %c0_i32_0 = arith.constant 0 : i32
    %5 = vector.broadcast %c0_i32_0 : i32 to vector<32x1xi32>
    %6 = arith.cmpi ne, %4, %5 : vector<32x1xi32>
    %c0_i32_1 = arith.constant 0 : i32
    %7 = vector.broadcast %c0_i32_1 : i32 to vector<32x1xi32>
    %8 = arith.cmpi slt, %4, %7 : vector<32x1xi32>
    %c0_i32_2 = arith.constant 0 : i32
    %9 = arith.cmpi slt, %2, %c0_i32_2 : i32
    %10 = vector.broadcast %9 : i1 to vector<32x1xi1>
    %11 = vector.broadcast %10 : vector<32x1xi1> to vector<32x1xi1>
    %12 = arith.xori %8, %11 : vector<32x1xi1>
    %13 = arith.andi %12, %6 : vector<32x1xi1>
    %14 = vector.broadcast %2 : i32 to vector<32x1xi32>
    %15 = arith.addi %4, %14 : vector<32x1xi32>
    %16 = arith.select %13, %15, %4 : vector<32x1xi1>, vector<32x1xi32>
    %c0 = arith.constant 0 : index
    %c0_3 = arith.constant 0 : index
    %17 = vector.load %arg1[%c0, %c0_3] : memref<32x8xf32, #tpu.memory_space<vmem>>, vector<32x8xf32>
    %18 = arith.truncf %17 : vector<32x8xf32> to vector<32x8xbf16>
    %c0_4 = arith.constant 0 : index
    %c0_5 = arith.constant 0 : index
    %19 = vector.load %arg3[%c0_4, %c0_5] : memref<8x128xbf16, #tpu.memory_space<vmem>>, vector<8x128xbf16>
    %cst = arith.constant dense<0.000000e+00> : vector<32x128xf32>
    %20 = tpu.matmul %18, %19, %cst {dimension_numbers = #tpu.dot_dimension_numbers<[1], [0], [0], [1], [0, 0, 1, 1], [], []>} : vector<32x8xbf16>, vector<8x128xbf16>, vector<32x128xf32> -> vector<32x128xf32>
    %21 = vector.shape_cast %20 : vector<32x128xf32> to vector<2x16x128xf32>
    %c0_6 = arith.constant 0 : index
    %c0_7 = arith.constant 0 : index
    %22 = vector.load %arg2[%c0_6, %c0_7] : memref<16x128xf32, #tpu.memory_space<vmem>>, vector<16x128xf32>
    %23 = vector.shape_cast %22 : vector<16x128xf32> to vector<1x16x128xf32>
    %24 = vector.broadcast %23 : vector<1x16x128xf32> to vector<2x16x128xf32>
    %25 = arith.addf %21, %24 : vector<2x16x128xf32>
    %26 = vector.shape_cast %25 : vector<2x16x128xf32> to vector<32x128xf32>
    %27 = arith.truncf %26 : vector<32x128xf32> to vector<32x128xbf16>
    %c2_i32 = arith.constant 2 : i32
    %28 = tpu.dynamic_rotate %27 by %c2_i32 dim 0 : vector<32x128xbf16>, i32 -> vector<32x128xbf16>
    %c2_i32_8 = arith.constant 2 : i32
    %29 = vector.broadcast %c2_i32_8 : i32 to vector<32x1xi32>
    %30 = arith.cmpi sge, %16, %29 : vector<32x1xi32>
    %cst_9 = arith.constant 0.000000e+00 : bf16
    %31 = vector.broadcast %cst_9 : bf16 to vector<32x128xbf16>
    %32 = vector.shape_cast %30 : vector<32x1xi1> to vector<32x1xi1>
    %33 = vector.broadcast %32 : vector<32x1xi1> to vector<32x128xi1>
    %34 = arith.select %33, %28, %31 : vector<32x128xi1>, vector<32x128xbf16>
    %c1_i32_10 = arith.constant 1 : i32
    %35 = tpu.dynamic_rotate %27 by %c1_i32_10 dim 0 : vector<32x128xbf16>, i32 -> vector<32x128xbf16>
    %c1_i32_11 = arith.constant 1 : i32
    %36 = vector.broadcast %c1_i32_11 : i32 to vector<32x1xi32>
    %37 = arith.cmpi sge, %16, %36 : vector<32x1xi32>
    %cst_12 = arith.constant 0.000000e+00 : bf16
    %38 = vector.broadcast %cst_12 : bf16 to vector<32x128xbf16>
    %39 = vector.shape_cast %37 : vector<32x1xi1> to vector<32x1xi1>
    %40 = vector.broadcast %39 : vector<32x1xi1> to vector<32x128xi1>
    %41 = arith.select %40, %35, %38 : vector<32x128xi1>, vector<32x128xbf16>
    %42 = tpu.concatenate %34, %41, %27 in 1 : vector<32x128xbf16>, vector<32x128xbf16>, vector<32x128xbf16> -> vector<32x384xbf16>
    %c0_13 = arith.constant 0 : index
    %c0_14 = arith.constant 0 : index
    %43 = vector.load %arg4[%c0_13, %c0_14] : memref<384x128xbf16, #tpu.memory_space<vmem>>, vector<384x128xbf16>
    %cst_15 = arith.constant dense<0.000000e+00> : vector<32x128xf32>
    %44 = tpu.matmul %42, %43, %cst_15 {dimension_numbers = #tpu.dot_dimension_numbers<[1], [0], [0], [1], [0, 0, 1, 1], [], []>} : vector<32x384xbf16>, vector<384x128xbf16>, vector<32x128xf32> -> vector<32x128xf32>
    %c0_16 = arith.constant 0 : index
    %c0_17 = arith.constant 0 : index
    %45 = vector.load %arg5[%c0_16, %c0_17] : memref<1x128xf32, #tpu.memory_space<vmem>>, vector<1x128xf32>
    %46 = vector.broadcast %45 : vector<1x128xf32> to vector<32x128xf32>
    %47 = arith.addf %44, %46 : vector<32x128xf32>
    %cst_18 = arith.constant 0.000000e+00 : f32
    %48 = vector.broadcast %cst_18 : f32 to vector<32x128xf32>
    %49 = arith.maximumf %47, %48 : vector<32x128xf32>
    %50 = arith.truncf %49 : vector<32x128xf32> to vector<32x128xbf16>
    %c4_i32 = arith.constant 4 : i32
    %51 = tpu.dynamic_rotate %50 by %c4_i32 dim 0 : vector<32x128xbf16>, i32 -> vector<32x128xbf16>
    %c4_i32_19 = arith.constant 4 : i32
    %52 = vector.broadcast %c4_i32_19 : i32 to vector<32x1xi32>
    %53 = arith.cmpi sge, %16, %52 : vector<32x1xi32>
    %cst_20 = arith.constant 0.000000e+00 : bf16
    %54 = vector.broadcast %cst_20 : bf16 to vector<32x128xbf16>
    %55 = vector.shape_cast %53 : vector<32x1xi1> to vector<32x1xi1>
    %56 = vector.broadcast %55 : vector<32x1xi1> to vector<32x128xi1>
    %57 = arith.select %56, %51, %54 : vector<32x128xi1>, vector<32x128xbf16>
    %c2_i32_21 = arith.constant 2 : i32
    %58 = tpu.dynamic_rotate %50 by %c2_i32_21 dim 0 : vector<32x128xbf16>, i32 -> vector<32x128xbf16>
    %c2_i32_22 = arith.constant 2 : i32
    %59 = vector.broadcast %c2_i32_22 : i32 to vector<32x1xi32>
    %60 = arith.cmpi sge, %16, %59 : vector<32x1xi32>
    %cst_23 = arith.constant 0.000000e+00 : bf16
    %61 = vector.broadcast %cst_23 : bf16 to vector<32x128xbf16>
    %62 = vector.shape_cast %60 : vector<32x1xi1> to vector<32x1xi1>
    %63 = vector.broadcast %62 : vector<32x1xi1> to vector<32x128xi1>
    %64 = arith.select %63, %58, %61 : vector<32x128xi1>, vector<32x128xbf16>
    %65 = tpu.concatenate %57, %64, %50 in 1 : vector<32x128xbf16>, vector<32x128xbf16>, vector<32x128xbf16> -> vector<32x384xbf16>
    %c0_24 = arith.constant 0 : index
    %c0_25 = arith.constant 0 : index
    %66 = vector.load %arg6[%c0_24, %c0_25] : memref<384x128xbf16, #tpu.memory_space<vmem>>, vector<384x128xbf16>
    %cst_26 = arith.constant dense<0.000000e+00> : vector<32x128xf32>
    %67 = tpu.matmul %65, %66, %cst_26 {dimension_numbers = #tpu.dot_dimension_numbers<[1], [0], [0], [1], [0, 0, 1, 1], [], []>} : vector<32x384xbf16>, vector<384x128xbf16>, vector<32x128xf32> -> vector<32x128xf32>
    %c0_27 = arith.constant 0 : index
    %c0_28 = arith.constant 0 : index
    %68 = vector.load %arg7[%c0_27, %c0_28] : memref<1x128xf32, #tpu.memory_space<vmem>>, vector<1x128xf32>
    %69 = vector.broadcast %68 : vector<1x128xf32> to vector<32x128xf32>
    %70 = arith.addf %67, %69 : vector<32x128xf32>
    %cst_29 = arith.constant 0.000000e+00 : f32
    %71 = vector.broadcast %cst_29 : f32 to vector<32x128xf32>
    %72 = arith.maximumf %70, %71 : vector<32x128xf32>
    %cst_30 = arith.constant dense<0.000000e+00> : vector<32xf32>
    %73 = vector.multi_reduction <add>, %72, %cst_30 [1] : vector<32x128xf32> to vector<32xf32>
    %74 = vector.shape_cast %73 : vector<32xf32> to vector<32x1xf32>
    %cst_31 = arith.constant 3.125000e-02 : f32
    %75 = vector.broadcast %cst_31 : f32 to vector<32x1xf32>
    %76 = arith.mulf %74, %75 : vector<32x1xf32>
    %77 = arith.mulf %72, %72 : vector<32x128xf32>
    %cst_32 = arith.constant dense<0.000000e+00> : vector<32xf32>
    %78 = vector.multi_reduction <add>, %77, %cst_32 [1] : vector<32x128xf32> to vector<32xf32>
    %79 = vector.shape_cast %78 : vector<32xf32> to vector<32x1xf32>
    %cst_33 = arith.constant 3.125000e-02 : f32
    %80 = vector.broadcast %cst_33 : f32 to vector<32x1xf32>
    %81 = arith.mulf %79, %80 : vector<32x1xf32>
    %82 = arith.mulf %76, %76 : vector<32x1xf32>
    %83 = arith.subf %81, %82 : vector<32x1xf32>
    %cst_34 = arith.constant 0.000000e+00 : f32
    %84 = vector.broadcast %cst_34 : f32 to vector<32x1xf32>
    %85 = arith.maximumf %83, %84 : vector<32x1xf32>
    %86 = vector.broadcast %76 : vector<32x1xf32> to vector<32x128xf32>
    %87 = arith.subf %72, %86 : vector<32x128xf32>
    %cst_35 = arith.constant 9.99999974E-6 : f32
    %88 = vector.broadcast %cst_35 : f32 to vector<32x1xf32>
    %89 = arith.addf %85, %88 : vector<32x1xf32>
    %90 = math.rsqrt %89 : vector<32x1xf32>
    %91 = vector.broadcast %90 : vector<32x1xf32> to vector<32x128xf32>
    %92 = arith.mulf %87, %91 : vector<32x128xf32>
    %c0_36 = arith.constant 0 : index
    %c0_37 = arith.constant 0 : index
    %93 = vector.load %arg8[%c0_36, %c0_37] : memref<1x128xf32, #tpu.memory_space<vmem>>, vector<1x128xf32>
    %94 = vector.broadcast %93 : vector<1x128xf32> to vector<32x128xf32>
    %95 = arith.mulf %92, %94 : vector<32x128xf32>
    %c0_38 = arith.constant 0 : index
    %c0_39 = arith.constant 0 : index
    %96 = vector.load %arg9[%c0_38, %c0_39] : memref<1x128xf32, #tpu.memory_space<vmem>>, vector<1x128xf32>
    %97 = vector.broadcast %96 : vector<1x128xf32> to vector<32x128xf32>
    %98 = arith.addf %95, %97 : vector<32x128xf32>
    %c0_40 = arith.constant 0 : index
    %c0_41 = arith.constant 0 : index
    %99 = vector.load %arg10[%c0_40, %c0_41] : memref<32x128xf32, #tpu.memory_space<vmem>>, vector<32x128xf32>
    tpu.vector_store %arg10[%c0_40, %c0_41], %98 {strides = array<i32>} : memref<32x128xf32, #tpu.memory_space<vmem>>, vector<32x128xf32>,
    return
  }
  func.func @transform_0(%arg0: i32) -> (i32, i32) {
    %c0_i32 = arith.constant 0 : i32
    %c0_i32_0 = arith.constant 0 : i32
    return %arg0, %c0_i32 : i32, i32
  }
  func.func @transform_1(%arg0: i32) -> (i32, i32) {
    %c0_i32 = arith.constant 0 : i32
    %c0_i32_0 = arith.constant 0 : i32
    %c0_i32_1 = arith.constant 0 : i32
    return %c0_i32, %c0_i32_0 : i32, i32
  }
  func.func @transform_2(%arg0: i32) -> (i32, i32) {
    %c0_i32 = arith.constant 0 : i32
    %c0_i32_0 = arith.constant 0 : i32
    %c0_i32_1 = arith.constant 0 : i32
    return %c0_i32, %c0_i32_0 : i32, i32
  }
  func.func @transform_3(%arg0: i32) -> (i32, i32) {
    %c0_i32 = arith.constant 0 : i32
    %c0_i32_0 = arith.constant 0 : i32
    %c0_i32_1 = arith.constant 0 : i32
    return %c0_i32, %c0_i32_0 : i32, i32
  }
  func.func @transform_4(%arg0: i32) -> (i32, i32) {
    %c0_i32 = arith.constant 0 : i32
    %c0_i32_0 = arith.constant 0 : i32
    %c0_i32_1 = arith.constant 0 : i32
    return %c0_i32, %c0_i32_0 : i32, i32
  }
  func.func @transform_5(%arg0: i32) -> (i32, i32) {
    %c0_i32 = arith.constant 0 : i32
    %c0_i32_0 = arith.constant 0 : i32
    %c0_i32_1 = arith.constant 0 : i32
    return %c0_i32, %c0_i32_0 : i32, i32
  }
  func.func @transform_6(%arg0: i32) -> (i32, i32) {
    %c0_i32 = arith.constant 0 : i32
    %c0_i32_0 = arith.constant 0 : i32
    %c0_i32_1 = arith.constant 0 : i32
    return %c0_i32, %c0_i32_0 : i32, i32
  }
  func.func @transform_7(%arg0: i32) -> (i32, i32) {
    %c0_i32 = arith.constant 0 : i32
    %c0_i32_0 = arith.constant 0 : i32
    %c0_i32_1 = arith.constant 0 : i32
    return %c0_i32, %c0_i32_0 : i32, i32
  }
  func.func @transform_8(%arg0: i32) -> (i32, i32) {
    %c0_i32 = arith.constant 0 : i32
    %c0_i32_0 = arith.constant 0 : i32
    %c0_i32_1 = arith.constant 0 : i32
    return %c0_i32, %c0_i32_0 : i32, i32
  }
  func.func @transform_9(%arg0: i32) -> (i32, i32) {
    %c0_i32 = arith.constant 0 : i32
    %c0_i32_0 = arith.constant 0 : i32
    return %arg0, %c0_i32 : i32, i32
  }
}

module attributes {stable_mosaic.version = 11 : i64} {
  func.func @kernel(%arg0: i32, %arg1: memref<32x8xf32, #tpu.memory_space<vmem>>, %arg2: memref<32x128xf32, #tpu.memory_space<vmem>>, %arg3: memref<8x128xbf16, #tpu.memory_space<vmem>>, %arg4: memref<384x128xbf16, #tpu.memory_space<vmem>>, %arg5: memref<1x128xf32, #tpu.memory_space<vmem>>, %arg6: memref<384x128xbf16, #tpu.memory_space<vmem>>, %arg7: memref<1x128xf32, #tpu.memory_space<vmem>>, %arg8: memref<1x128xf32, #tpu.memory_space<vmem>>, %arg9: memref<1x128xf32, #tpu.memory_space<vmem>>, %arg10: memref<32x128xf32, #tpu.memory_space<vmem>>) attributes {dimension_semantics = [#tpu.dimension_semantics<parallel>], iteration_bounds = array<i64: 1>, scalar_prefetch = 0 : i64, scratch_operands = 0 : i64, tpu.core_type = #tpu.core_type<tc>, window_params = [{transform_indices = @transform_0, window_bounds = array<i64: 32, 8>}, {pipeline_mode = #tpu.pipeline_mode<synchronous>, transform_indices = @transform_1, window_bounds = array<i64: 32, 128>}, {pipeline_mode = #tpu.pipeline_mode<synchronous>, transform_indices = @transform_2, window_bounds = array<i64: 8, 128>}, {pipeline_mode = #tpu.pipeline_mode<synchronous>, transform_indices = @transform_3, window_bounds = array<i64: 384, 128>}, {pipeline_mode = #tpu.pipeline_mode<synchronous>, transform_indices = @transform_4, window_bounds = array<i64: 1, 128>}, {pipeline_mode = #tpu.pipeline_mode<synchronous>, transform_indices = @transform_5, window_bounds = array<i64: 384, 128>}, {pipeline_mode = #tpu.pipeline_mode<synchronous>, transform_indices = @transform_6, window_bounds = array<i64: 1, 128>}, {pipeline_mode = #tpu.pipeline_mode<synchronous>, transform_indices = @transform_7, window_bounds = array<i64: 1, 128>}, {pipeline_mode = #tpu.pipeline_mode<synchronous>, transform_indices = @transform_8, window_bounds = array<i64: 1, 128>}, {transform_indices = @transform_9, window_bounds = array<i64: 32, 128>}]} {
    %0 = tpu.iota {dimensions = array<i32: 0>} : vector<32x1xi32>
    %c16_i32 = arith.constant 16 : i32
    %c0_i32 = arith.constant 0 : i32
    %1 = arith.cmpi eq, %c16_i32, %c0_i32 : i32
    %c1_i32 = arith.constant 1 : i32
    %2 = arith.select %1, %c1_i32, %c16_i32 : i32
    %3 = vector.broadcast %2 : i32 to vector<32x1xi32>
    %4 = arith.remsi %0, %3 : vector<32x1xi32>
    %c0_i32_0 = arith.constant 0 : i32
    %5 = vector.broadcast %c0_i32_0 : i32 to vector<32x1xi32>
    %6 = arith.cmpi ne, %4, %5 : vector<32x1xi32>
    %c0_i32_1 = arith.constant 0 : i32
    %7 = vector.broadcast %c0_i32_1 : i32 to vector<32x1xi32>
    %8 = arith.cmpi slt, %4, %7 : vector<32x1xi32>
    %c0_i32_2 = arith.constant 0 : i32
    %9 = arith.cmpi slt, %2, %c0_i32_2 : i32
    %10 = vector.broadcast %9 : i1 to vector<32x1xi1>
    %11 = vector.broadcast %10 : vector<32x1xi1> to vector<32x1xi1>
    %12 = arith.xori %8, %11 : vector<32x1xi1>
    %13 = arith.andi %12, %6 : vector<32x1xi1>
    %14 = vector.broadcast %2 : i32 to vector<32x1xi32>
    %15 = arith.addi %4, %14 : vector<32x1xi32>
    %16 = arith.select %13, %15, %4 : vector<32x1xi1>, vector<32x1xi32>
    %c0 = arith.constant 0 : index
    %c0_3 = arith.constant 0 : index
    %17 = vector.load %arg1[%c0, %c0_3] : memref<32x8xf32, #tpu.memory_space<vmem>>, vector<32x8xf32>
    %18 = arith.truncf %17 : vector<32x8xf32> to vector<32x8xbf16>
    %c0_4 = arith.constant 0 : index
    %c0_5 = arith.constant 0 : index
    %19 = vector.load %arg3[%c0_4, %c0_5] : memref<8x128xbf16, #tpu.memory_space<vmem>>, vector<8x128xbf16>
    %cst = arith.constant dense<0.000000e+00> : vector<32x128xf32>
    %20 = tpu.matmul %18, %19, %cst {dimension_numbers = #tpu.dot_dimension_numbers<[1], [0], [0], [1], [0, 0, 1, 1], [], []>} : vector<32x8xbf16>, vector<8x128xbf16>, vector<32x128xf32> -> vector<32x128xf32>
    %c0_6 = arith.constant 0 : index
    %c0_7 = arith.constant 0 : index
    %21 = vector.load %arg2[%c0_6, %c0_7] : memref<32x128xf32, #tpu.memory_space<vmem>>, vector<32x128xf32>
    %22 = arith.addf %20, %21 : vector<32x128xf32>
    %23 = arith.truncf %22 : vector<32x128xf32> to vector<32x128xbf16>
    %c2_i32 = arith.constant 2 : i32
    %24 = tpu.dynamic_rotate %22 by %c2_i32 dim 0 : vector<32x128xf32>, i32 -> vector<32x128xf32>
    %c2_i32_8 = arith.constant 2 : i32
    %25 = vector.broadcast %c2_i32_8 : i32 to vector<32x1xi32>
    %26 = arith.cmpi sge, %16, %25 : vector<32x1xi32>
    %cst_9 = arith.constant 0.000000e+00 : f32
    %27 = vector.broadcast %cst_9 : f32 to vector<32x128xf32>
    %28 = vector.shape_cast %26 : vector<32x1xi1> to vector<32x1xi1>
    %29 = vector.broadcast %28 : vector<32x1xi1> to vector<32x128xi1>
    %30 = arith.select %29, %24, %27 : vector<32x128xi1>, vector<32x128xf32>
    %31 = arith.truncf %30 : vector<32x128xf32> to vector<32x128xbf16>
    %c1_i32_10 = arith.constant 1 : i32
    %32 = tpu.dynamic_rotate %22 by %c1_i32_10 dim 0 : vector<32x128xf32>, i32 -> vector<32x128xf32>
    %c1_i32_11 = arith.constant 1 : i32
    %33 = vector.broadcast %c1_i32_11 : i32 to vector<32x1xi32>
    %34 = arith.cmpi sge, %16, %33 : vector<32x1xi32>
    %cst_12 = arith.constant 0.000000e+00 : f32
    %35 = vector.broadcast %cst_12 : f32 to vector<32x128xf32>
    %36 = vector.shape_cast %34 : vector<32x1xi1> to vector<32x1xi1>
    %37 = vector.broadcast %36 : vector<32x1xi1> to vector<32x128xi1>
    %38 = arith.select %37, %32, %35 : vector<32x128xi1>, vector<32x128xf32>
    %39 = arith.truncf %38 : vector<32x128xf32> to vector<32x128xbf16>
    %40 = tpu.concatenate %31, %39, %23 in 1 : vector<32x128xbf16>, vector<32x128xbf16>, vector<32x128xbf16> -> vector<32x384xbf16>
    %c0_13 = arith.constant 0 : index
    %c0_14 = arith.constant 0 : index
    %41 = vector.load %arg4[%c0_13, %c0_14] : memref<384x128xbf16, #tpu.memory_space<vmem>>, vector<384x128xbf16>
    %cst_15 = arith.constant dense<0.000000e+00> : vector<32x128xf32>
    %42 = tpu.matmul %40, %41, %cst_15 {dimension_numbers = #tpu.dot_dimension_numbers<[1], [0], [0], [1], [0, 0, 1, 1], [], []>} : vector<32x384xbf16>, vector<384x128xbf16>, vector<32x128xf32> -> vector<32x128xf32>
    %c0_16 = arith.constant 0 : index
    %c0_17 = arith.constant 0 : index
    %43 = vector.load %arg5[%c0_16, %c0_17] : memref<1x128xf32, #tpu.memory_space<vmem>>, vector<1x128xf32>
    %44 = vector.broadcast %43 : vector<1x128xf32> to vector<32x128xf32>
    %45 = arith.addf %42, %44 : vector<32x128xf32>
    %cst_18 = arith.constant 0.000000e+00 : f32
    %46 = vector.broadcast %cst_18 : f32 to vector<32x128xf32>
    %47 = arith.maximumf %45, %46 : vector<32x128xf32>
    %48 = arith.truncf %47 : vector<32x128xf32> to vector<32x128xbf16>
    %c4_i32 = arith.constant 4 : i32
    %49 = tpu.dynamic_rotate %47 by %c4_i32 dim 0 : vector<32x128xf32>, i32 -> vector<32x128xf32>
    %c4_i32_19 = arith.constant 4 : i32
    %50 = vector.broadcast %c4_i32_19 : i32 to vector<32x1xi32>
    %51 = arith.cmpi sge, %16, %50 : vector<32x1xi32>
    %cst_20 = arith.constant 0.000000e+00 : f32
    %52 = vector.broadcast %cst_20 : f32 to vector<32x128xf32>
    %53 = vector.shape_cast %51 : vector<32x1xi1> to vector<32x1xi1>
    %54 = vector.broadcast %53 : vector<32x1xi1> to vector<32x128xi1>
    %55 = arith.select %54, %49, %52 : vector<32x128xi1>, vector<32x128xf32>
    %56 = arith.truncf %55 : vector<32x128xf32> to vector<32x128xbf16>
    %c2_i32_21 = arith.constant 2 : i32
    %57 = tpu.dynamic_rotate %47 by %c2_i32_21 dim 0 : vector<32x128xf32>, i32 -> vector<32x128xf32>
    %c2_i32_22 = arith.constant 2 : i32
    %58 = vector.broadcast %c2_i32_22 : i32 to vector<32x1xi32>
    %59 = arith.cmpi sge, %16, %58 : vector<32x1xi32>
    %cst_23 = arith.constant 0.000000e+00 : f32
    %60 = vector.broadcast %cst_23 : f32 to vector<32x128xf32>
    %61 = vector.shape_cast %59 : vector<32x1xi1> to vector<32x1xi1>
    %62 = vector.broadcast %61 : vector<32x1xi1> to vector<32x128xi1>
    %63 = arith.select %62, %57, %60 : vector<32x128xi1>, vector<32x128xf32>
    %64 = arith.truncf %63 : vector<32x128xf32> to vector<32x128xbf16>
    %65 = tpu.concatenate %56, %64, %48 in 1 : vector<32x128xbf16>, vector<32x128xbf16>, vector<32x128xbf16> -> vector<32x384xbf16>
    %c0_24 = arith.constant 0 : index
    %c0_25 = arith.constant 0 : index
    %66 = vector.load %arg6[%c0_24, %c0_25] : memref<384x128xbf16, #tpu.memory_space<vmem>>, vector<384x128xbf16>
    %cst_26 = arith.constant dense<0.000000e+00> : vector<32x128xf32>
    %67 = tpu.matmul %65, %66, %cst_26 {dimension_numbers = #tpu.dot_dimension_numbers<[1], [0], [0], [1], [0, 0, 1, 1], [], []>} : vector<32x384xbf16>, vector<384x128xbf16>, vector<32x128xf32> -> vector<32x128xf32>
    %c0_27 = arith.constant 0 : index
    %c0_28 = arith.constant 0 : index
    %68 = vector.load %arg7[%c0_27, %c0_28] : memref<1x128xf32, #tpu.memory_space<vmem>>, vector<1x128xf32>
    %69 = vector.broadcast %68 : vector<1x128xf32> to vector<32x128xf32>
    %70 = arith.addf %67, %69 : vector<32x128xf32>
    %cst_29 = arith.constant 0.000000e+00 : f32
    %71 = vector.broadcast %cst_29 : f32 to vector<32x128xf32>
    %72 = arith.maximumf %70, %71 : vector<32x128xf32>
    %cst_30 = arith.constant dense<0.000000e+00> : vector<32xf32>
    %73 = vector.multi_reduction <add>, %72, %cst_30 [1] : vector<32x128xf32> to vector<32xf32>
    %74 = vector.shape_cast %73 : vector<32xf32> to vector<32x1xf32>
    %cst_31 = arith.constant 3.125000e-02 : f32
    %75 = vector.broadcast %cst_31 : f32 to vector<32x1xf32>
    %76 = arith.mulf %74, %75 : vector<32x1xf32>
    %77 = arith.mulf %72, %72 : vector<32x128xf32>
    %cst_32 = arith.constant dense<0.000000e+00> : vector<32xf32>
    %78 = vector.multi_reduction <add>, %77, %cst_32 [1] : vector<32x128xf32> to vector<32xf32>
    %79 = vector.shape_cast %78 : vector<32xf32> to vector<32x1xf32>
    %cst_33 = arith.constant 3.125000e-02 : f32
    %80 = vector.broadcast %cst_33 : f32 to vector<32x1xf32>
    %81 = arith.mulf %79, %80 : vector<32x1xf32>
    %82 = arith.mulf %76, %76 : vector<32x1xf32>
    %83 = arith.subf %81, %82 : vector<32x1xf32>
    %cst_34 = arith.constant 0.000000e+00 : f32
    %84 = vector.broadcast %cst_34 : f32 to vector<32x1xf32>
    %85 = arith.maximumf %83, %84 : vector<32x1xf32>
    %86 = vector.broadcast %76 : vector<32x1xf32> to vector<32x128xf32>
    %87 = arith.subf %72, %86 : vector<32x128xf32>
    %cst_35 = arith.constant 9.99999974E-6 : f32
    %88 = vector.broadcast %cst_35 : f32 to vector<32x1xf32>
    %89 = arith.addf %85, %88 : vector<32x1xf32>
    %90 = math.rsqrt %89 : vector<32x1xf32>
    %91 = vector.broadcast %90 : vector<32x1xf32> to vector<32x128xf32>
    %92 = arith.mulf %87, %91 : vector<32x128xf32>
    %c0_36 = arith.constant 0 : index
    %c0_37 = arith.constant 0 : index
    %93 = vector.load %arg8[%c0_36, %c0_37] : memref<1x128xf32, #tpu.memory_space<vmem>>, vector<1x128xf32>
    %94 = vector.broadcast %93 : vector<1x128xf32> to vector<32x128xf32>
    %95 = arith.mulf %92, %94 : vector<32x128xf32>
    %c0_38 = arith.constant 0 : index
    %c0_39 = arith.constant 0 : index
    %96 = vector.load %arg9[%c0_38, %c0_39] : memref<1x128xf32, #tpu.memory_space<vmem>>, vector<1x128xf32>
    %97 = vector.broadcast %96 : vector<1x128xf32> to vector<32x128xf32>
    %98 = arith.addf %95, %97 : vector<32x128xf32>
    %c0_40 = arith.constant 0 : index
    %c0_41 = arith.constant 0 : index
    %99 = vector.load %arg10[%c0_40, %c0_41] : memref<32x128xf32, #tpu.memory_space<vmem>>, vector<32x128xf32>
    tpu.vector_store %arg10[%c0_40, %c0_41], %98 {strides = array<i32>} : memref<32x128xf32, #tpu.memory_space<vmem>>, vector<32x128xf32>,
    return
  }
  func.func @transform_0(%arg0: i32) -> (i32, i32) {
    %c0_i32 = arith.constant 0 : i32
    %c0_i32_0 = arith.constant 0 : i32
    return %arg0, %c0_i32 : i32, i32
  }
  func.func @transform_1(%arg0: i32) -> (i32, i32) {
    %c0_i32 = arith.constant 0 : i32
    %c0_i32_0 = arith.constant 0 : i32
    %c0_i32_1 = arith.constant 0 : i32
    return %c0_i32, %c0_i32_0 : i32, i32
  }
  func.func @transform_2(%arg0: i32) -> (i32, i32) {
    %c0_i32 = arith.constant 0 : i32
    %c0_i32_0 = arith.constant 0 : i32
    %c0_i32_1 = arith.constant 0 : i32
    return %c0_i32, %c0_i32_0 : i32, i32
  }
  func.func @transform_3(%arg0: i32) -> (i32, i32) {
    %c0_i32 = arith.constant 0 : i32
    %c0_i32_0 = arith.constant 0 : i32
    %c0_i32_1 = arith.constant 0 : i32
    return %c0_i32, %c0_i32_0 : i32, i32
  }
  func.func @transform_4(%arg0: i32) -> (i32, i32) {
    %c0_i32 = arith.constant 0 : i32
    %c0_i32_0 = arith.constant 0 : i32
    %c0_i32_1 = arith.constant 0 : i32
    return %c0_i32, %c0_i32_0 : i32, i32
  }
  func.func @transform_5(%arg0: i32) -> (i32, i32) {
    %c0_i32 = arith.constant 0 : i32
    %c0_i32_0 = arith.constant 0 : i32
    %c0_i32_1 = arith.constant 0 : i32
    return %c0_i32, %c0_i32_0 : i32, i32
  }
  func.func @transform_6(%arg0: i32) -> (i32, i32) {
    %c0_i32 = arith.constant 0 : i32
    %c0_i32_0 = arith.constant 0 : i32
    %c0_i32_1 = arith.constant 0 : i32
    return %c0_i32, %c0_i32_0 : i32, i32
  }
  func.func @transform_7(%arg0: i32) -> (i32, i32) {
    %c0_i32 = arith.constant 0 : i32
    %c0_i32_0 = arith.constant 0 : i32
    %c0_i32_1 = arith.constant 0 : i32
    return %c0_i32, %c0_i32_0 : i32, i32
  }
  func.func @transform_8(%arg0: i32) -> (i32, i32) {
    %c0_i32 = arith.constant 0 : i32
    %c0_i32_0 = arith.constant 0 : i32
    %c0_i32_1 = arith.constant 0 : i32
    return %c0_i32, %c0_i32_0 : i32, i32
  }
  func.func @transform_9(%arg0: i32) -> (i32, i32) {
    %c0_i32 = arith.constant 0 : i32
    %c0_i32_0 = arith.constant 0 : i32
    return %arg0, %c0_i32 : i32, i32
  }
}

</mosaic_0001>

<bundles_post_ra>
// kernel: tpu_custom_call.1
= control target key start
LH: loop header
LB: loop body
LE: loop exit
PB: predicated region body
PF: predicated region fallthrough
CT: control target
= control target key end

     0   :  { %14 = vsyncpa [#allocation3], 0  ;;  %s1573_s0 = inlined_call_operand.vmem [shape: f32[32,8], index: 0, kind: input, shape index: {}]   ;;  %s1574_s1 = inlined_call_operand.vmem [shape: f32[32,128], index: 1, kind: input, shape index: {}]   ;;  %s1575_s2 = inlined_call_operand.vmem [shape: bf16[8,128], index: 2, kind: input, shape index: {}]   ;;  %s1576_s3 = inlined_call_operand.hbm [shape: bf16[384,128], index: 3, kind: input, shape index: {}]   ;;  %s1577_s4 = inlined_call_operand.vmem [shape: f32[1,128], index: 4, kind: input, shape index: {}]   ;;  %s1578_s5 = inlined_call_operand.hbm [shape: bf16[384,128], index: 5, kind: input, shape index: {}]   ;;  %s1579_s6 = inlined_call_operand.vmem [shape: f32[1,128], index: 6, kind: input, shape index: {}]   ;;  %s1580_s7 = inlined_call_operand.vmem [shape: f32[1,128], index: 7, kind: input, shape index: {}]   ;;  %s1581_s8 = inlined_call_operand.vmem [shape: f32[1,128], index: 8, kind: input, shape index: {}]   ;;  %s1582_s9 = inlined_call_operand.hbm [shape: f32[32,128], index: 9, kind: output, shape index: {}]  }
   0x1   :  { %15 = vsyncpa [#allocation6], 0 }
   0x2   :  { %16 = vsyncpa [#allocation4], 0  ;;  %s27_s11 = sshll.u32 %s1576_s3, 4  ;;  %s1344_s12 = smov [#allocation2]   ;;  %s28_s11 = int_to_ptr.hbm [resolvable:$true] %s27_s11 }
   0x3   :  { %s29_s13 = sshll.u32 %s1344_s12, 4  ;;  %s42_s16 = sshll.u32 %s1578_s5, 4  ;;  %s30_s13 = int_to_ptr.vmem [resolvable:$true] %s29_s13  ;;  %s43_s16 = int_to_ptr.hbm [resolvable:$true] %s42_s16 }
   0x4   :  { %s1345_s17 = smov 64   ;;  %s1346_s18 = smov 4  }
   0x5   :  { %35 = dma.hbm_to_vmem [thread:$0]  %s28_s11, 3072, %s30_s13, [#allocation3], %s1345_s17, %s1345_s17, %s1346_s18  }
   0x6   :  { %s1347_s19 = smov [#allocation5]  }
   0x7   :  { %s44_s20 = sshll.u32 %s1347_s19, 4  ;;  %s45_s20 = int_to_ptr.vmem [resolvable:$true] %s44_s20 }
   0x8   :  { %50 = dma.hbm_to_vmem [thread:$0]  %s43_s16, 3072, %s45_s20, [#allocation6], %s1345_s17, %s1345_s17, %s1346_s18  }
   0x9   :  { %1338 = dma.done.wait [#allocation3], 3072  }
   0xa   :  { %1339 = vsyncadd [#allocation3], 4294964224 }
   0xb   :  { %1340 = dma.done.wait [#allocation6], 3072  }
   0xc   :  { %1341 = vsyncadd [#allocation6], 4294964224  ;;  %vm137_vm0 = vcmask 1043456   ;;  %v125_v0 = vld [vmem:[%s1575_s2] sm:$0xf]  ;;  %v120_v2 = vld [vmem:[%s1573_s0 + $0x8] sm:$0xff]  ;;  %v66_v42 = vlaneseq }
   0xd   :  { %v119_v1 = vld [vmem:[%s1573_s0] sm:$0xff]  ;;  %v139_v3 = vsel %vm137_vm0, %v125_v0, 0  ;;  %v1206_v5 = vld [vmem:[#allocation2 + $0xb8] sm:$0xff]  ;;  %vm130_vm1 = vcmask 64512   ;;  %v1205_v6 = vld [vmem:[#allocation2 + $0xb0] sm:$0xff]  ;;  %s975_s3 = sshll.u32 %s1582_s9, 4  ;;  %s976_s3 = int_to_ptr.hbm [resolvable:$true] %s975_s3 }
   0xe   :  { %v123_v4 = vpack.c.bf16 %v120_v2, %v119_v1  ;;  %148 = vmatpush.bf16.msra.mxu0 %v139_v3  ;;  %492 = vmatpush.bf16.msra.mxu3 %v1206_v5  ;;  %v1204_v7 = vld [vmem:[#allocation2 + $0xa8] sm:$0xff]  ;;  %v1203_v8 = vld [vmem:[#allocation2 + $0xa0] sm:$0xff]  ;;  %v121_v9 = vld [vmem:[%s1573_s0 + $0x10] sm:$0xff]  ;;  %v1431_v46 = vshrl.u32 %v66_v42, 7  ;;  %s1349_s21 = smov 128   ;;  %s1350_s22 = smov 8  }
   0xf   :  { %v122_v10 = vld [vmem:[%s1573_s0 + $0x18] sm:$0xff]  ;;  %v1201_v15 = vld [vmem:[#allocation2 + $0x90] sm:$0xff]  ;;  %v1200_v18 = vld [vmem:[#allocation2 + $0x88] sm:$0xff] }
  0x10   :  { %v124_v11 = vpack.c.bf16 %v122_v10, %v121_v9  ;;  %v1202_v12 = vld [vmem:[#allocation2 + $0x98] sm:$0xff]  ;;  %v1189_v16 = vld [vmem:[#allocation2 + $0x30] sm:$0xff]  ;;  %v1188_v19 = vld [vmem:[#allocation2 + $0x28] sm:$0xff]  ;;  %v1437_v51 = vand.u32 15, %v1431_v46  ;;  %vm168_vm2 = vcmp.lt.s32.totalorder %v1431_v46, 2  ;;  %vm197_vm3 = vcmp.lt.s32.totalorder %v1431_v46, 1 }
  0x11   :  { %989 = vmatmul.msk.bf16.vlgmr.msra.gmra.mxu0 %vm130_vm1, %v123_v4  ;;  %v1190_v13 = vld [vmem:[#allocation2 + $0x38] sm:$0xff]  ;;  %v1197_v17 = vld [vmem:[#allocation2 + $0x70] sm:$0xff]  ;;  %v1196_v20 = vld [vmem:[#allocation2 + $0x68] sm:$0xff]  ;;  %vm523_vm8 = vcmp.lt.s32.totalorder %v1431_v46, 4 }
  0x12   :  { %493 = vmatpush.bf16.msra.mxu3 %v1205_v6  ;;  %v1198_v14 = vld [vmem:[#allocation2 + $0x78] sm:$0xff]  ;;  %454 = vmatpush.bf16.msra.mxu1 %v1190_v13  ;;  %v1199_v21 = vld [vmem:[#allocation2 + $0x80] sm:$0xff]  ;;  %v1185_v26 = vld [vmem:[#allocation2 + $0x10] sm:$0xff]  ;;  %vm173_vm4 = vcmp.ge.s32.totalorder %v1437_v51, 2  ;;  %vm202_vm5 = vcmp.ge.s32.totalorder %v1437_v51, 1  ;;  %v69_v6 = vadd.s32 16, %v1431_v46 }
  0x13   :  { %473 = vmatpush.bf16.msra.mxu2 %v1198_v14  ;;  %v1187_v22 = vld [vmem:[#allocation2 + $0x20] sm:$0xff]  ;;  %v1186_v24 = vld [vmem:[#allocation2 + $0x18] sm:$0xff]  ;;  %v1193_v27 = vld [vmem:[#allocation2 + $0x50] sm:$0xff]  ;;  %vm528_vm9 = vcmp.ge.s32.totalorder %v1437_v51, 4 }
  0x14   :  { %v1195_v23 = vld [vmem:[#allocation2 + $0x60] sm:$0xff]  ;;  %v1194_v25 = vld [vmem:[#allocation2 + $0x58] sm:$0xff]  ;;  %v1184_v28 = vld [vmem:[#allocation2 + $0x8] sm:$0xff]  ;;  %v1454_v14 = vand.u32 15, %v69_v6 }
  0x15   :  { %v1192_v29 = vld [vmem:[#allocation2 + $0x48] sm:$0xff]  ;;  %v1183_v31 = vld [vmem:[#allocation2] sm:$0xff]  ;;  %v128_v45 = vld [vmem:[%s1574_s1 + $0x10] sm:$0xff] }
  0x16   :  { %494 = vmatpush.bf16.msra.mxu3 %v1204_v7  ;;  %455 = vmatpush.bf16.msra.mxu1 %v1189_v16  ;;  %v1191_v32 = vld [vmem:[#allocation2 + $0x40] sm:$0xff]  ;;  %v127_v35 = vld [vmem:[%s1574_s1 + $0x8] sm:$0xff]  ;;  %v129_v50 = vld [vmem:[%s1574_s1 + $0x18] sm:$0xff]  ;;  %vm175_vm6 = vcmp.ge.s32.totalorder %v1454_v14, 2  ;;  %vm204_vm7 = vcmp.ge.s32.totalorder %v1454_v14, 1  ;;  %vm530_vm10 = vcmp.ge.s32.totalorder %v1454_v14, 4 }
  0x17   :  { %474 = vmatpush.bf16.msra.mxu2 %v1197_v17  ;;  %v126_v33 = vld [vmem:[%s1574_s1] sm:$0xff]  ;;  %v1220_v42 = vld [vmem:[#allocation5 + $0x68] sm:$0xff] }
  0x1a   :  { %495 = vmatpush.bf16.msra.mxu3 %v1203_v8  ;;  %456 = vmatpush.bf16.msra.mxu1 %v1188_v19 }
  0x1b   :  { %475 = vmatpush.bf16.msra.mxu2 %v1196_v20 }
  0x1e   :  { %496 = vmatpush.bf16.msra.mxu3 %v1202_v12  ;;  %457 = vmatpush.bf16.msra.mxu1 %v1187_v22 }
  0x1f   :  { %476 = vmatpush.bf16.msra.mxu2 %v1195_v23 }
  0x21   :  { %990 = vmatmul.msk.bf16.gmra.mxu0 %vm130_vm1, %v124_v11 }
  0x22   :  { %497 = vmatpush.bf16.msra.mxu3 %v1201_v15  ;;  %458 = vmatpush.bf16.msra.mxu1 %v1186_v24 }
  0x23   :  { %477 = vmatpush.bf16.msra.mxu2 %v1194_v25 }
  0x26   :  { %498 = vmatpush.bf16.msra.mxu3 %v1200_v18  ;;  %459 = vmatpush.bf16.msra.mxu1 %v1185_v26 }
  0x27   :  { %478 = vmatpush.bf16.msra.mxu2 %v1193_v27 }
  0x2a   :  { %499 = vmatpush.bf16.msra.mxu3 %v1199_v21  ;;  %460 = vmatpush.bf16.msra.mxu1 %v1184_v28 }
  0x2b   :  { %479 = vmatpush.bf16.msra.mxu2 %v1192_v29 }
  0x2e   :  { %461 = vmatpush.bf16.msra.mxu1 %v1183_v31 }
  0x2f   :  { %480 = vmatpush.bf16.msra.mxu2 %v1191_v32 }
  0x8e   :  { %v150_v30 = vpop.f32.mrf.mxu0 }
  0x8f   :  { %v151_v34 = vadd.f32 %v150_v30, %v126_v33 }
  0x91   :  { %v160_v38 = vpack.c.bf16 %v151_v34, %v151_v34  ;;  %v164_v52 = vrot.slane %v151_v34, 6  ;;  %v193_v53 = vrot.slane %v151_v34, 7 }
  0x93   :  { %v250_v40 = vunpack.c.l.b16 %v160_v38  ;;  %v1468_v38 = vld [vmem:[#allocation5 + $0xb0] sm:$0xff] }
  0x96   :  { %v152_v36 = vpop.f32.mrf.mxu0 }
  0x97   :  { %v153_v37 = vadd.f32 %v152_v36, %v127_v35  ;;  %v1230_v35 = vld [vmem:[#allocation5 + $0xb8] sm:$0xff] }
  0x98   :  { %1239 = vmatpush.bf16.msrb.mxu2 %v1230_v35  ;;  %v1222_v36 = vld [vmem:[#allocation5 + $0x78] sm:$0xff] }
  0x99   :  { %v161_v39 = vpack.c.bf16 %v153_v37, %v153_v37  ;;  %v165_v47 = vrot.slane %v153_v37, 6  ;;  %v194_v48 = vrot.slane %v153_v37, 7  ;;  %v1214_v37 = vld [vmem:[#allocation5 + $0x38] sm:$0xff]  ;;  %1231 = vmatpush.bf16.msrb.mxu3 %v1222_v36  ;;  %815 = vmatpush.bf16.msrb.mxu1 %v1222_v36 }
  0x9a   :  { %796 = vmatpush.bf16.msrb.mxu0 %v1214_v37 }
  0x9b   :  { %v251_v41 = vunpack.c.l.b16 %v161_v39  ;;  %v171_v57 = vsel %vm168_vm2, %v164_v52, %v165_v47  ;;  %v200_v58 = vsel %vm197_vm3, %v193_v53, %v194_v48  ;;  %v1221_v39 = vld [vmem:[#allocation5 + $0x70] sm:$0xff] }
  0x9c   :  { %v190_v62 = vpack.c.bf16 %v171_v57, %v171_v57  ;;  %v219_v63 = vpack.c.bf16 %v200_v58, %v200_v58  ;;  %1240 = vmatpush.bf16.msrb.mxu2 %v1468_v38  ;;  %v1474_v57 = vld [vmem:[#allocation5 + $0x88] sm:$0xff] }
  0x9d   :  { %v254_v43 = vpack.c.b16 %v251_v41, %v250_v40  ;;  %v1213_v40 = vld [vmem:[#allocation5 + $0x30] sm:$0xff]  ;;  %v1228_v41 = vld [vmem:[#allocation5 + $0xa8] sm:$0xff]  ;;  %1232 = vmatpush.bf16.msrb.mxu3 %v1221_v39  ;;  %816 = vmatpush.bf16.msrb.mxu1 %v1221_v39 }
  0x9e   :  { %v155_v44 = vpop.f32.mrf.mxu0  ;;  %v227_v11 = vunpack.c.l.b16 %v190_v62  ;;  %v239_v13 = vunpack.c.l.b16 %v219_v63  ;;  %797 = vmatpush.bf16.msrb.mxu0 %v1213_v40  ;;  %v1208_v58 = vld [vmem:[#allocation5 + $0x8] sm:$0xff]  ;;  %v1215_v63 = vld [vmem:[#allocation5 + $0x40] sm:$0xff] }
  0x9f   :  { %500 = vmatmul.bf16.vlgmr.msra.gmra.mxu3 %v254_v43  ;;  %v156_v49 = vadd.f32 %v155_v44, %v128_v45  ;;  %v1212_v43 = vld [vmem:[#allocation5 + $0x28] sm:$0xff]  ;;  %v1227_v44 = vld [vmem:[#allocation5 + $0xa0] sm:$0xff] }
  0xa0   :  { %1241 = vmatpush.bf16.msrb.mxu2 %v1228_v41  ;;  %v1219_v45 = vld [vmem:[#allocation5 + $0x60] sm:$0xff] }
  0xa1   :  { %v162_v56 = vpack.c.bf16 %v156_v49, %v156_v49  ;;  %v166_v15 = vrot.slane %v156_v49, 6  ;;  %v195_v16 = vrot.slane %v156_v49, 7  ;;  %1233 = vmatpush.bf16.msrb.mxu3 %v1220_v42  ;;  %817 = vmatpush.bf16.msrb.mxu1 %v1220_v42  ;;  %v1218_v49 = vld [vmem:[#allocation5 + $0x58] sm:$0xff] }
  0xa2   :  { %798 = vmatpush.bf16.msrb.mxu0 %v1212_v43 }
  0xa3   :  { %v252_v0 = vunpack.c.l.b16 %v162_v56  ;;  %v170_v19 = vsel %vm168_vm2, %v165_v47, %v166_v15  ;;  %v199_v20 = vsel %vm197_vm3, %v194_v48, %v195_v16  ;;  %v1211_v47 = vld [vmem:[#allocation5 + $0x20] sm:$0xff]  ;;  %v1226_v48 = vld [vmem:[#allocation5 + $0x98] sm:$0xff]  ;;  %v1209_v56 = vld [vmem:[#allocation5 + $0x10] sm:$0xff] }
  0xa4   :  { %v187_v23 = vsel %vm175_vm6, %v170_v19, 0.0  ;;  %v216_v24 = vsel %vm204_vm7, %v199_v20, 0.0  ;;  %1242 = vmatpush.bf16.msrb.mxu2 %v1227_v44 }
  0xa5   :  { %v191_v27 = vpack.c.bf16 %v187_v23, %v187_v23  ;;  %v220_v28 = vpack.c.bf16 %v216_v24, %v216_v24  ;;  %1234 = vmatpush.bf16.msrb.mxu3 %v1219_v45  ;;  %818 = vmatpush.bf16.msrb.mxu1 %v1219_v45 }
  0xa6   :  { %v157_v54 = vpop.f32.mrf.mxu0  ;;  %799 = vmatpush.bf16.msrb.mxu0 %v1211_v47 }
  0xa7   :  { %v158_v55 = vadd.f32 %v157_v54, %v129_v50  ;;  %v228_v31 = vunpack.c.l.b16 %v191_v27  ;;  %v240_v32 = vunpack.c.l.b16 %v220_v28  ;;  %v1210_v50 = vld [vmem:[#allocation5 + $0x18] sm:$0xff] }
  0xa8   :  { %1243 = vmatpush.bf16.msrb.mxu2 %v1226_v48 }
  0xa9   :  { %v167_v59 = vrot.slane %v158_v55, 6  ;;  %v196_v60 = vrot.slane %v158_v55, 7  ;;  %v163_v61 = vpack.c.bf16 %v158_v55, %v158_v55  ;;  %1235 = vmatpush.bf16.msrb.mxu3 %v1218_v49  ;;  %819 = vmatpush.bf16.msrb.mxu1 %v1218_v49  ;;  %v1217_v55 = vld [vmem:[#allocation5 + $0x50] sm:$0xff] }
  0xaa   :  { %800 = vmatpush.bf16.msrb.mxu0 %v1210_v50 }
  0xab   :  { %v253_v1 = vunpack.c.l.b16 %v163_v61  ;;  %v172_v2 = vsel %vm168_vm2, %v167_v59, %v164_v52  ;;  %v201_v3 = vsel %vm197_vm3, %v196_v60, %v193_v53  ;;  %v169_v21 = vsel %vm168_vm2, %v166_v15, %v167_v59  ;;  %v1471_v52 = vld [vmem:[#allocation5 + $0x90] sm:$0xff]  ;;  %v1216_v59 = vld [vmem:[#allocation5 + $0x48] sm:$0xff] }
  0xac   :  { %v185_v4 = vsel %vm173_vm4, %v172_v2, 0.0  ;;  %v214_v5 = vsel %vm202_vm5, %v201_v3, 0.0  ;;  %v198_v22 = vsel %vm197_vm3, %v195_v16, %v196_v60  ;;  %v192_v25 = vpack.c.bf16 %v169_v21, %v169_v21  ;;  %1244 = vmatpush.bf16.msrb.mxu2 %v1471_v52  ;;  %v1477_v60 = vld [vmem:[#allocation5 + $0x80] sm:$0xff] }
  0xad   :  { %v255_v7 = vpack.c.b16 %v253_v1, %v252_v0  ;;  %v189_v8 = vpack.c.bf16 %v185_v4, %v185_v4  ;;  %v218_v9 = vpack.c.bf16 %v214_v5, %v214_v5  ;;  %v221_v26 = vpack.c.bf16 %v198_v22, %v198_v22  ;;  %1236 = vmatpush.bf16.msrb.mxu3 %v1217_v55  ;;  %v1207_v0 = vld [vmem:[#allocation5] sm:$0xff] }
  0xae   :  { %v229_v29 = vunpack.c.l.b16 %v192_v25  ;;  %820 = vmatpush.bf16.msrb.mxu1 %v1217_v55  ;;  %801 = vmatpush.bf16.msrb.mxu0 %v1209_v56  ;;  %v1254_v2 = vld [vmem:[%s1577_s4] ss:$0 sm:$0xff] }
  0xaf   :  { %505 = vmatmul.bf16.gmra.mxu3 %v255_v7  ;;  %v226_v10 = vunpack.c.l.b16 %v189_v8  ;;  %v238_v12 = vunpack.c.l.b16 %v218_v9  ;;  %v241_v30 = vunpack.c.l.b16 %v221_v26 }
  0xb0   :  { %v231_v33 = vpack.c.b16 %v229_v29, %v228_v31  ;;  %1245 = vmatpush.bf16.msrb.mxu2 %v1474_v57 }
  0xb1   :  { %v230_v17 = vpack.c.b16 %v227_v11, %v226_v10  ;;  %v242_v18 = vpack.c.b16 %v239_v13, %v238_v12  ;;  %v243_v34 = vpack.c.b16 %v241_v30, %v240_v32  ;;  %1237 = vmatpush.bf16.msrb.mxu3 %v1216_v59 }
  0xb2   :  { %821 = vmatpush.bf16.msrb.mxu1 %v1216_v59  ;;  %802 = vmatpush.bf16.msrb.mxu0 %v1208_v58 }
  0xb3   :  { %462 = vmatmul.bf16.vlgmr.msra.gmra.mxu1 %v230_v17  ;;  %481 = vmatmul.bf16.vlgmr.msra.gmra.mxu2 %v242_v18 }
  0xb4   :  { %1246 = vmatpush.bf16.msrb.mxu2 %v1477_v60 }
  0xb5   :  { %1238 = vmatpush.bf16.msrb.mxu3 %v1215_v63 }
  0xb6   :  { %822 = vmatpush.bf16.msrb.mxu1 %v1215_v63  ;;  %803 = vmatpush.bf16.msrb.mxu0 %v1207_v0 }
  0xba   :  { %834 = vmatpush.bf16.msra.mxu0 %v1230_v35 }
  0xbe   :  { %835 = vmatpush.bf16.msra.mxu0 %v1468_v38 }
  0xc2   :  { %836 = vmatpush.bf16.msra.mxu0 %v1228_v41 }
  0xc3   :  { %467 = vmatmul.bf16.gmra.mxu1 %v231_v33  ;;  %486 = vmatmul.bf16.gmra.mxu2 %v243_v34 }
  0xc6   :  { %837 = vmatpush.bf16.msra.mxu0 %v1227_v44 }
  0xca   :  { %838 = vmatpush.bf16.msra.mxu0 %v1226_v48 }
  0xce   :  { %839 = vmatpush.bf16.msra.mxu0 %v1471_v52 }
  0xd2   :  { %840 = vmatpush.bf16.msra.mxu0 %v1474_v57 }
  0xd6   :  { %841 = vmatpush.bf16.msra.mxu0 %v1477_v60 }
 0x122   :  { %v501_v54 = vpop.f32.mrf.mxu3 }
 0x12a   :  { %v503_v1 = vpop.f32.mrf.mxu3 }
 0x130   :  { %v463_v53 = vpop.f32.mrf.mxu1 }
 0x131   :  { %v464_v7 = vadd.f32 %v1254_v2, %v463_v53 }
 0x132   :  { %v506_v10 = vpop.f32.mrf.mxu3 }
 0x136   :  { %v482_v61 = vpop.f32.mrf.mxu2 }
 0x137   :  { %v483_v8 = vadd.f32 %v482_v61, %v464_v7 }
 0x138   :  { %v465_v62 = vpop.f32.mrf.mxu1 }
 0x139   :  { %v466_v4 = vadd.f32 %v1254_v2, %v465_v62  ;;  %v502_v15 = vadd.f32 %v501_v54, %v483_v8 }
 0x13a   :  { %v508_v27 = vpop.f32.mrf.mxu3 }
 0x13b   :  { %v1486_v20 = vmax.f32 %v502_v15, 0.0  ;;  %v1255_v15 = vld [vmem:[%s1579_s6] ss:$0 sm:$0xff] }
 0x13d   :  { %v519_v29 = vrot.slane %v1486_v20, 4  ;;  %v548_v30 = vrot.slane %v1486_v20, 6 }
 0x13e   :  { %v484_v3 = vpop.f32.mrf.mxu2 }
 0x13f   :  { %v485_v6 = vadd.f32 %v484_v3, %v466_v4 }
 0x140   :  { %v468_v5 = vpop.f32.mrf.mxu1 }
 0x141   :  { %v469_v9 = vadd.f32 %v1254_v2, %v468_v5  ;;  %v504_v11 = vadd.f32 %v503_v1, %v485_v6 }
 0x143   :  { %v1484_v17 = vmax.f32 %v504_v11, 0.0 }
 0x145   :  { %v549_v23 = vrot.slane %v1484_v17, 6  ;;  %v520_v25 = vrot.slane %v1484_v17, 4 }
 0x146   :  { %v487_v12 = vpop.f32.mrf.mxu2 }
 0x147   :  { %v488_v13 = vadd.f32 %v487_v12, %v469_v9  ;;  %v526_v35 = vsel %vm523_vm8, %v519_v29, %v520_v25  ;;  %v554_v36 = vsel %vm168_vm2, %v548_v30, %v549_v23  ;;  %v516_v9 = vpack.c.bf16 %v1484_v17, %v1484_v17 }
 0x148   :  { %v470_v18 = vpop.f32.mrf.mxu1  ;;  %v545_v42 = vpack.c.bf16 %v526_v35, %v526_v35  ;;  %v561_v43 = vpack.c.bf16 %v554_v36, %v554_v36 }
 0x149   :  { %v507_v16 = vadd.f32 %v506_v10, %v488_v13  ;;  %v471_v22 = vadd.f32 %v1254_v2, %v470_v18  ;;  %v515_v10 = vpack.c.bf16 %v1486_v20, %v1486_v20  ;;  %v593_v11 = vunpack.c.l.b16 %v516_v9 }
 0x14a   :  { %v569_v59 = vunpack.c.l.b16 %v545_v42  ;;  %v581_v62 = vunpack.c.l.b16 %v561_v43 }
 0x14b   :  { %v513_v19 = vmax.f32 %v507_v16, 0.0  ;;  %v592_v12 = vunpack.c.l.b16 %v515_v10 }
 0x14d   :  { %v550_v21 = vrot.slane %v513_v19, 6  ;;  %v517_v32 = vpack.c.bf16 %v513_v19, %v513_v19  ;;  %v521_v0 = vrot.slane %v513_v19, 4  ;;  %v596_v13 = vpack.c.b16 %v593_v11, %v592_v12 }
 0x14e   :  { %v489_v24 = vpop.f32.mrf.mxu2 }
 0x14f   :  { %v490_v26 = vadd.f32 %v489_v24, %v471_v22  ;;  %v553_v28 = vsel %vm168_vm2, %v549_v23, %v550_v21  ;;  %v594_v40 = vunpack.c.l.b16 %v517_v32  ;;  %v525_v51 = vsel %vm523_vm8, %v520_v25, %v521_v0 }
 0x150   :  { %v558_v34 = vsel %vm175_vm6, %v553_v28, 0.0  ;;  %v542_v3 = vsel %vm530_vm10, %v525_v51, 0.0 }
 0x151   :  { %v509_v31 = vadd.f32 %v508_v27, %v490_v26  ;;  %v562_v41 = vpack.c.bf16 %v558_v34, %v558_v34  ;;  %v546_v5 = vpack.c.bf16 %v542_v3, %v542_v3 }
 0x153   :  { %v514_v33 = vmax.f32 %v509_v31, 0.0  ;;  %v582_v56 = vunpack.c.l.b16 %v562_v41  ;;  %v570_v7 = vunpack.c.l.b16 %v546_v5 }
 0x155   :  { %v522_v37 = vrot.slane %v514_v33, 4  ;;  %v551_v38 = vrot.slane %v514_v33, 6  ;;  %v518_v39 = vpack.c.bf16 %v514_v33, %v514_v33 }
 0x157   :  { %v595_v44 = vunpack.c.l.b16 %v518_v39  ;;  %v552_v45 = vsel %vm168_vm2, %v550_v21, %v551_v38  ;;  %v527_v47 = vsel %vm523_vm8, %v522_v37, %v519_v29  ;;  %v555_v48 = vsel %vm168_vm2, %v551_v38, %v548_v30 }
 0x158   :  { %v563_v49 = vpack.c.bf16 %v552_v45, %v552_v45  ;;  %v540_v50 = vsel %vm528_vm9, %v527_v47, 0.0  ;;  %v556_v52 = vsel %vm173_vm4, %v555_v48, 0.0  ;;  %v524_v60 = vsel %vm523_vm8, %v521_v0, %v522_v37 }
 0x159   :  { %v597_v53 = vpack.c.b16 %v595_v44, %v594_v40  ;;  %v544_v54 = vpack.c.bf16 %v540_v50, %v540_v50  ;;  %v560_v55 = vpack.c.bf16 %v556_v52, %v556_v52  ;;  %v547_v4 = vpack.c.bf16 %v524_v60, %v524_v60 }
 0x15a   :  { %v583_v57 = vunpack.c.l.b16 %v563_v49 }
 0x15b   :  { %847 = vmatmul.bf16.vlgmr.msrb.gmra.mxu2 %v597_v53  ;;  %v568_v58 = vunpack.c.l.b16 %v544_v54  ;;  %v580_v61 = vunpack.c.l.b16 %v560_v55  ;;  %v571_v6 = vunpack.c.l.b16 %v547_v4 }
 0x15c   :  { %v585_v63 = vpack.c.b16 %v583_v57, %v582_v56 }
 0x15d   :  { %v572_v1 = vpack.c.b16 %v569_v59, %v568_v58  ;;  %v584_v2 = vpack.c.b16 %v581_v62, %v580_v61  ;;  %v573_v8 = vpack.c.b16 %v571_v6, %v570_v7 }
 0x15e   :  { %828 = vmatmul.bf16.vlgmr.msrb.gmra.mxu3 %v585_v63 }
 0x15f   :  { %804 = vmatmul.bf16.vlgmr.msrb.gmra.mxu0 %v572_v1  ;;  %823 = vmatmul.bf16.vlgmr.msrb.gmra.mxu1 %v584_v2 }
 0x16f   :  { %809 = vmatmul.bf16.gmra.mxu0 %v573_v8 }
 0x17f   :  { %842 = vmatmul.bf16.vlgmr.msra.gmra.mxu0 %v596_v13 }
 0x1dc   :  { %v805_v14 = vpop.f32.mrf.mxu0  ;;  %v824_v28 = vpop.f32.mrf.mxu1 }
 0x1dd   :  { %v806_v26 = vadd.f32 %v1255_v15, %v805_v14 }
 0x1de   :  { %v848_v21 = vpop.f32.mrf.mxu2 }
 0x1df   :  { %v825_v31 = vadd.f32 %v824_v28, %v806_v26  ;;  %v1256_v28 = vld [vmem:[%s1580_s7] ss:$0 sm:$0xff]  ;;  %s1348_s7 = smov [#allocation7]  }
 0x1e1   :  { %v829_v16 = vpop.f32.mrf.mxu3 }
 0x1e4   :  { %v807_v46 = vpop.f32.mrf.mxu0  ;;  %v826_v38 = vpop.f32.mrf.mxu1 }
 0x1e5   :  { %v808_v35 = vadd.f32 %v1255_v15, %v807_v46 }
 0x1e6   :  { %v850_v29 = vpop.f32.mrf.mxu2 }
 0x1e7   :  { %v827_v39 = vadd.f32 %v826_v38, %v808_v35 }
 0x1e9   :  { %v831_v25 = vpop.f32.mrf.mxu3 }
 0x1ec   :  { %v810_v18 = vpop.f32.mrf.mxu0 }
 0x1ed   :  { %v811_v19 = vadd.f32 %v1255_v15, %v810_v18 }
 0x1ef   :  { %v830_v22 = vadd.f32 %v829_v16, %v811_v19 }
 0x1f1   :  { %v849_v23 = vadd.f32 %v848_v21, %v830_v22 }
 0x1f3   :  { %v1525_v17 = vmax.f32 %v849_v23, 0.0 }
 0x1f4   :  { %v812_v24 = vpop.f32.mrf.mxu0 }
 0x1f5   :  { %v813_v20 = vadd.f32 %v1255_v15, %v812_v24  ;;  %861 = vadd.xlane.f32.xlu1 %v1525_v17  ;;  %v871_v45 = vmul.f32 %v1525_v17, %v1525_v17 }
 0x1f7   :  { %v832_v27 = vadd.f32 %v831_v25, %v813_v20 }
 0x1f9   :  { %v851_v30 = vadd.f32 %v850_v29, %v832_v27 }
 0x1fb   :  { %v1528_v32 = vmax.f32 %v851_v30, 0.0 }
 0x1fc   :  { %v843_v33 = vpop.f32.mrf.mxu0 }
 0x1fd   :  { %v844_v34 = vadd.f32 %v843_v33, %v825_v31  ;;  %863 = vadd.xlane.f32.xlu1 %v1528_v32  ;;  %v872_v40 = vmul.f32 %v1528_v32, %v1528_v32 }
 0x1ff   :  { %v1531_v36 = vmax.f32 %v844_v34, 0.0  ;;  %v1257_v34 = vld [vmem:[%s1581_s8] ss:$0 sm:$0xff]  ;;  %s973_s8 = sshll.u32 %s1348_s7, 4  ;;  %s974_s8 = int_to_ptr.vmem [resolvable:$true] %s973_s8 }
 0x201   :  { %857 = vadd.xlane.f32.xlu0 %v1531_v36  ;;  %v869_v37 = vmul.f32 %v1531_v36, %v1531_v36 }
 0x203   :  { %873 = vadd.xlane.f32.xlu2 %v869_v37 }
 0x204   :  { %v845_v41 = vpop.f32.mrf.mxu0 }
 0x205   :  { %v846_v42 = vadd.f32 %v845_v41, %v827_v39  ;;  %879 = vadd.xlane.f32.xlu1 %v872_v40 }
 0x207   :  { %v1538_v43 = vmax.f32 %v846_v42, 0.0 }
 0x209   :  { %859 = vadd.xlane.f32.xlu0 %v1538_v43  ;;  %v870_v44 = vmul.f32 %v1538_v43, %v1538_v43 }
 0x20b   :  { %875 = vadd.xlane.f32.xlu2 %v870_v44 }
 0x211   :  { %877 = vadd.xlane.f32.xlu0 %v871_v45 }
 0x268   :  { %v862_v47 = vpop.xlane.xlu1 %861 }
 0x269   :  { %v1553_v5 = vmul.f32 0.03125, %v862_v47 }
 0x26b   :  { %v887_v10 = vmul.f32 %v1553_v5, %v1553_v5 }
 0x270   :  { %v864_v48 = vpop.xlane.xlu1 %863 }
 0x271   :  { %v1545_v50 = vmul.f32 0.03125, %v864_v48 }
 0x273   :  { %v888_v57 = vmul.f32 %v1545_v50, %v1545_v50  ;;  %v900_v33 = vsub.f32 %v1528_v32, %v1545_v50 }
 0x274   :  { %v858_v49 = vpop.xlane.xlu0 %857 }
 0x275   :  { %v865_v52 = vmul.f32 0.03125, %v858_v49 }
 0x276   :  { %v874_v53 = vpop.xlane.xlu2 %873 }
 0x277   :  { %v885_v54 = vmul.f32 %v865_v52, %v865_v52  ;;  %v881_v55 = vmul.f32 0.03125, %v874_v53  ;;  %v897_v27 = vsub.f32 %v1531_v36, %v865_v52 }
 0x278   :  { %v880_v56 = vpop.xlane.xlu1 %879 }
 0x279   :  { %v889_v58 = vsub.f32 %v881_v55, %v885_v54  ;;  %v884_v59 = vmul.f32 0.03125, %v880_v56 }
 0x27b   :  { %v893_v61 = vmax.f32 %v889_v58, 0.0  ;;  %v892_v62 = vsub.f32 %v884_v59, %v888_v57  ;;  %v899_v58 = vsub.f32 %v1525_v17, %v1553_v5 }
 0x27c   :  { %v860_v63 = vpop.xlane.xlu0 %859 }
 0x27d   :  { %v901_v0 = vadd.f32 1e-05, %v893_v61  ;;  %v896_v1 = vmax.f32 %v892_v62, 0.0  ;;  %v1549_v2 = vmul.f32 0.03125, %v860_v63 }
 0x27e   :  { %v876_v51 = vpop.xlane.xlu2 %875 }
 0x27f   :  { %1258 = vrsqrt.f32 %v901_v0  ;;  %v904_v60 = vadd.f32 1e-05, %v896_v1  ;;  %v886_v3 = vmul.f32 %v1549_v2, %v1549_v2  ;;  %v882_v4 = vmul.f32 0.03125, %v876_v51 }
 0x280   :  { %vm911_vm12 = vweird.f32 %v901_v0  ;;  %v898_v50 = vsub.f32 %v1538_v43, %v1549_v2 }
 0x281   :  { %1260 = vrsqrt.f32 %v904_v60  ;;  %v890_v6 = vsub.f32 %v882_v4, %v886_v3  ;;  %vm941_vm15 = vweird.f32 %v904_v60 }
 0x283   :  { %v894_v7 = vmax.f32 %v890_v6, 0.0 }
 0x284   :  { %v878_v8 = vpop.xlane.xlu0 %877 }
 0x285   :  { %v1259_v9 = vpop.eup %1258  ;;  %v883_v11 = vmul.f32 0.03125, %v878_v8  ;;  %v902_v13 = vadd.f32 1e-05, %v894_v7 }
 0x286   :  { %v906_v12 = vmul.f32 %v1259_v9, %v901_v0  ;;  %vm912_vm11 = vweird.f32 %v1259_v9 }
 0x287   :  { %v1261_v14 = vpop.eup %1260  ;;  %v891_v46 = vsub.f32 %v883_v11, %v887_v10  ;;  %1262 = vrsqrt.f32 %v902_v13  ;;  %vm913_vm14 = vmor %vm911_vm12, %vm912_vm11  ;;  %vm921_vm2 = vweird.f32 %v902_v13 }
 0x288   :  { %v907_v15 = vmul.f32 %v1259_v9, %v906_v12  ;;  %v936_v16 = vmul.f32 %v1261_v14, %v904_v60  ;;  %vm942_vm13 = vweird.f32 %v1261_v14 }
 0x289   :  { %v895_v18 = vmax.f32 %v891_v46, 0.0  ;;  %vm943_vm0 = vmor %vm941_vm15, %vm942_vm13 }
 0x28a   :  { %v908_v19 = vmul.f32 0.5, %v907_v15  ;;  %v937_v21 = vmul.f32 %v1261_v14, %v936_v16 }
 0x28b   :  { %v903_v22 = vadd.f32 1e-05, %v895_v18 }
 0x28c   :  { %v909_v23 = vsub.f32 1.5, %v908_v19  ;;  %v938_v24 = vmul.f32 0.5, %v937_v21 }
 0x28d   :  { %1264 = vrsqrt.f32 %v903_v22  ;;  %v1263_v20 = vpop.eup %1262  ;;  %vm931_vm5 = vweird.f32 %v903_v22 }
 0x28e   :  { %v910_v25 = vmul.f32 %v1259_v9, %v909_v23  ;;  %v939_v26 = vsub.f32 1.5, %v938_v24  ;;  %v916_v29 = vmul.f32 %v1263_v20, %v902_v13  ;;  %vm922_vm1 = vweird.f32 %v1263_v20 }
 0x28f   :  { %vm923_vm3 = vmor %vm921_vm2, %vm922_vm1 }
 0x290   :  { %v914_v30 = vsel %vm913_vm14, %v1259_v9, %v910_v25  ;;  %v940_v31 = vmul.f32 %v1261_v14, %v939_v26  ;;  %v917_v37 = vmul.f32 %v1263_v20, %v916_v29 }
 0x291   :  { %v945_v35 = vmul.f32 %v914_v30, %v897_v27 }
 0x292   :  { %v944_v36 = vsel %vm943_vm0, %v1261_v14, %v940_v31  ;;  %v918_v41 = vmul.f32 0.5, %v917_v37 }
 0x293   :  { %v1265_v38 = vpop.eup %1264  ;;  %v953_v39 = vmul.f32 %v1256_v28, %v945_v35  ;;  %v948_v40 = vmul.f32 %v944_v36, %v900_v33 }
 0x294   :  { %v926_v42 = vmul.f32 %v1265_v38, %v903_v22  ;;  %v919_v47 = vsub.f32 1.5, %v918_v41  ;;  %vm932_vm4 = vweird.f32 %v1265_v38 }
 0x295   :  { %v961_v44 = vadd.f32 %v1257_v34, %v953_v39  ;;  %v956_v45 = vmul.f32 %v1256_v28, %v948_v40  ;;  %vm933_vm6 = vmor %vm931_vm5, %vm932_vm4 }
 0x296   :  { %v927_v48 = vmul.f32 %v1265_v38, %v926_v42  ;;  %v920_v49 = vmul.f32 %v1263_v20, %v919_v47 }
 0x297   :  { %965 = vst [vmem:[#allocation7] sm:$0xff] %v961_v44  ;;  %v964_v32 = vadd.f32 %v1257_v34, %v956_v45 }
 0x298   :  { %v928_v52 = vmul.f32 0.5, %v927_v48  ;;  %v924_v53 = vsel %vm923_vm3, %v1263_v20, %v920_v49 }
 0x299   :  { %968 = vst [vmem:[#allocation7 + $0x18] sm:$0xff] %v964_v32  ;;  %v946_v54 = vmul.f32 %v924_v53, %v898_v50 }
 0x29a   :  { %v929_v55 = vsub.f32 1.5, %v928_v52 }
 0x29b   :  { %v954_v56 = vmul.f32 %v1256_v28, %v946_v54 }
 0x29c   :  { %v930_v57 = vmul.f32 %v1265_v38, %v929_v55 }
 0x29d   :  { %v962_v59 = vadd.f32 %v1257_v34, %v954_v56 }
 0x29e   :  { %v934_v61 = vsel %vm933_vm6, %v1265_v38, %v930_v57 }
 0x29f   :  { %v947_v62 = vmul.f32 %v934_v61, %v899_v58  ;;  %966 = vst [vmem:[#allocation7 + $0x8] sm:$0xff] %v962_v59 }
 0x2a1   :  { %v955_v43 = vmul.f32 %v1256_v28, %v947_v62 }
 0x2a3   :  { %v963_v63 = vadd.f32 %v1257_v34, %v955_v43 }
 0x2a5   :  { %967 = vst [vmem:[#allocation7 + $0x10] sm:$0xff] %v963_v63 }
 0x2a6   :  { %981 = dma.vmem_to_hbm [thread:$0]  %s974_s8, 512, %s976_s3, [#allocation4], %s1349_s21, %s1349_s21, %s1350_s22  }
 0x2a7   :  { %1342 = dma.done.wait [#allocation4], 512  }
 0x2a8   :  { %1343 = vsyncadd [#allocation4], 4294966784 }
 0x2a9   :  { %986 = vsyncpa [#allocation3], 1 }
 0x2aa   :  { %987 = vsyncpa [#allocation6], 1 }
 0x2ab   :  { %988 = vsyncpa [#allocation4], 1 }

</bundles_post_ra>
